<compile_context>
chip_gen: v6e
topology: v6e:2x2x1
jax: 0.10.0
libtpu: 0.0.40
codegen_flags: <defaults>
</compile_context>

<pallas_src>
import functools

import jax
import jax.numpy as jnp
from jax.experimental import pallas as pl
from jax.experimental.pallas import tpu as pltpu


_LANE = 128          # vreg lane width
_SPLIT_ROWS = 256    # batches above this get >= 2 grid steps (v7x megacore)


def _round_up(x, m):
    return (x + m - 1) // m * m


# ---------------------------------------------------------------------------
# Fused kernel: out = sigmoid( relu(...relu(x@W1+b1)...) @ W_rec + b_rec )
# ---------------------------------------------------------------------------
def _fused_decoder_kernel(x_ref, *rest, n_hidden):
    """rest = (w1, b1, ..., wH, bH, w_rec, b_rec, o_ref)."""
    o_ref = rest[-1]
    p = rest[:-1]

    h = x_ref[...]
    # hidden MLP: Linear -> ReLU (bn=False, dropout=0 in the reference module)
    for i in range(n_hidden):
        w = p[2 * i][...]
        b = p[2 * i + 1][...]          # (1, N) broadcasts over rows
        h = jnp.maximum(
            jnp.dot(h.astype(w.dtype), w,
                    preferred_element_type=jnp.float32) + b, 0.0)

    # reconstruction Linear + Sigmoid output activation
    w = p[-2][...]
    b = p[-1][...]
    y = jnp.dot(h.astype(w.dtype), w, preferred_element_type=jnp.float32) + b

    # numerically-stable sigmoid: one exp + one (exact) reciprocal on the EUP
    z = jnp.exp(-jnp.abs(y))                       # in (0, 1], never overflows
    r = pl.reciprocal(1.0 + z, approx=False)       # sigmoid(|y|)
    o_ref[...] = jnp.where(y >= 0.0, r, 1.0 - r).astype(o_ref.dtype)


# ---------------------------------------------------------------------------
# Parameter prep: zero-pad hidden widths up to a lane multiple (bit-identical)
# ---------------------------------------------------------------------------
def _pad_params_lane_dense(hidden_params, recon_params, lane=_LANE,
                           matmul_dtype=jnp.float32):
    layers = [*hidden_params, recon_params]
    padded = []
    extra_rows = 0
    for idx, (w, b) in enumerate(layers):
        k, n = w.shape
        is_last = idx == len(layers) - 1
        n_pad = n if is_last else _round_up(n, lane)   # keep x_dim as-is
        w_p = jnp.zeros((k + extra_rows, n_pad), jnp.float32).at[:k, :n].set(w)
        b_p = jnp.zeros((n_pad,), jnp.float32).at[:n].set(b)
        padded.append((w_p.astype(matmul_dtype), b_p))  # bias stays f32
        extra_rows = n_pad - n
    return padded


def _choose_row_tile(m, block_m):
    """Row tile: whole 8-aligned batch if small; else >=2 grid steps."""
    m8 = _round_up(max(m, 1), 8)
    if m8 <= _SPLIT_ROWS:
        return m8
    return min(_round_up(block_m, 8), _round_up(pl.cdiv(m8, 2), 8))


# ---------------------------------------------------------------------------
# Wrapper
# ---------------------------------------------------------------------------
def decoder_forward(x, hidden_params, recon_params, *, block_m=512,
                    matmul_dtype=jnp.float32):
    """Run the fused decoder. x: (M, z_dim) f32."""
    m, z_dim = x.shape
    x_dim = recon_params[0].shape[1]
    n_hidden = len(hidden_params)

    tm = _choose_row_tile(m, block_m)
    grid = pl.cdiv(m, tm)            # ragged last block is masked by Pallas

    layers = _pad_params_lane_dense(hidden_params, recon_params,
                                    matmul_dtype=matmul_dtype)

    flat_params = []
    in_specs = [pl.BlockSpec((tm, z_dim), lambda i: (i, 0))]
    for w, b in layers:
        k, n = w.shape
        flat_params.append(w)
        flat_params.append(b.reshape(1, n))
        # full-block weight / bias; constant index_map => fetched once, kept
        # resident in VMEM across all grid steps (no re-DMA).
        in_specs.append(pl.BlockSpec((k, n), lambda i: (0, 0)))
        in_specs.append(pl.BlockSpec((1, n), lambda i: (0, 0)))

    # advisory cost estimate (padded dims, one exp + one reciprocal per elem)
    m_work = grid * tm
    dims = [z_dim] + [w.shape[1] for w, _ in layers]
    flops = sum(2 * m_work * dims[i] * dims[i + 1] for i in range(len(dims) - 1))
    bytes_accessed = 4 * (m_work * z_dim + m_work * x_dim) + sum(
        w.size * w.dtype.itemsize + b.size * 4 for w, b in layers)

    kernel = functools.partial(_fused_decoder_kernel, n_hidden=n_hidden)
    out = pl.pallas_call(
        kernel,
        out_shape=jax.ShapeDtypeStruct((m, x_dim), jnp.float32),
        grid=(grid,),
        in_specs=in_specs,
        out_specs=pl.BlockSpec((tm, x_dim), lambda i: (i, 0)),
        compiler_params=pltpu.CompilerParams(
            dimension_semantics=("parallel",)),
        cost_estimate=pl.CostEstimate(
            flops=flops,
            transcendentals=2 * m_work * x_dim,
            bytes_accessed=bytes_accessed),
    )(x, *flat_params)
    return out


# ---------------------------------------------------------------------------
# Parameter construction (deterministic synthetic init, PyTorch-style bounds)
# ---------------------------------------------------------------------------
def init_decoder_params(key, dims):
    """dims = [z_dim, [hidden_dims], x_dim]."""
    z_dim, h_dim, x_dim = dims
    layer_sizes = [z_dim, *h_dim]
    params = []
    for i in range(1, len(layer_sizes)):
        fan_in, fan_out = layer_sizes[i - 1], layer_sizes[i]
        key, kw, kb = jax.random.split(key, 3)
        bound = 1.0 / jnp.sqrt(fan_in)
        w = jax.random.uniform(kw, (fan_in, fan_out), jnp.float32, -bound, bound)
        b = jax.random.uniform(kb, (fan_out,), jnp.float32, -bound, bound)
        params.append((w, b))
    fan_in = layer_sizes[-1]
    key, kw, kb = jax.random.split(key, 3)
    bound = 1.0 / jnp.sqrt(fan_in)
    w = jax.random.uniform(kw, (fan_in, x_dim), jnp.float32, -bound, bound)
    b = jax.random.uniform(kb, (x_dim,), jnp.float32, -bound, bound)
    recon = (w, b)
    return params, recon


# ---------------------------------------------------------------------------
if __name__ == "__main__":
    # dims = [latent_dim, [hidden_dims], input_dim]
    dims = [32, [64, 48], 128]
    batch = 8

    key = jax.random.PRNGKey(0)
    key, kx = jax.random.split(key)
    x = jax.random.normal(kx, (batch, dims[0]), dtype=jnp.float32)

    hidden_params, recon_params = init_decoder_params(key, dims)

    out = decoder_forward(x, hidden_params, recon_params)
    out = jax.block_until_ready(out)

    # pure-JAX reference of the PyTorch module's forward pass
    h_ref = x
    for w, b in hidden_params:
        h_ref = jnp.maximum(h_ref @ w + b, 0.0)
    w, b = recon_params
    ref = jax.nn.sigmoid(h_ref @ w + b)

    assert out.shape == (batch, dims[2]), out.shape
    assert jnp.all((out >= 0.0) & (out <= 1.0))
    assert jnp.allclose(out, ref, atol=1e-5, rtol=1e-5), \
        float(jnp.max(jnp.abs(out - ref)))

    print("KERNEL_OK")
</pallas_src>

<mosaic_0001>
module attributes {stable_mosaic.version = 11 : i64} {
  func.func @_fused_decoder_kernel(%arg0: i32, %arg1: memref<8x32xf32, #tpu.memory_space<vmem>>, %arg2: memref<32x128xf32, #tpu.memory_space<vmem>>, %arg3: memref<1x128xf32, #tpu.memory_space<vmem>>, %arg4: memref<128x128xf32, #tpu.memory_space<vmem>>, %arg5: memref<1x128xf32, #tpu.memory_space<vmem>>, %arg6: memref<128x128xf32, #tpu.memory_space<vmem>>, %arg7: memref<1x128xf32, #tpu.memory_space<vmem>>, %arg8: memref<8x128xf32, #tpu.memory_space<vmem>>) attributes {dimension_semantics = [#tpu.dimension_semantics<parallel>], iteration_bounds = array<i64: 1>, scalar_prefetch = 0 : i64, scratch_operands = 0 : i64, tpu.core_type = #tpu.core_type<tc>, window_params = [{transform_indices = @transform_0, window_bounds = array<i64: 8, 32>}, {pipeline_mode = #tpu.pipeline_mode<synchronous>, transform_indices = @transform_1, window_bounds = array<i64: 32, 128>}, {pipeline_mode = #tpu.pipeline_mode<synchronous>, transform_indices = @transform_2, window_bounds = array<i64: 1, 128>}, {pipeline_mode = #tpu.pipeline_mode<synchronous>, transform_indices = @transform_3, window_bounds = array<i64: 128, 128>}, {pipeline_mode = #tpu.pipeline_mode<synchronous>, transform_indices = @transform_4, window_bounds = array<i64: 1, 128>}, {pipeline_mode = #tpu.pipeline_mode<synchronous>, transform_indices = @transform_5, window_bounds = array<i64: 128, 128>}, {pipeline_mode = #tpu.pipeline_mode<synchronous>, transform_indices = @transform_6, window_bounds = array<i64: 1, 128>}, {transform_indices = @transform_7, window_bounds = array<i64: 8, 128>}]} {
    %c0 = arith.constant 0 : index
    %c0_0 = arith.constant 0 : index
    %0 = vector.load %arg1[%c0, %c0_0] : memref<8x32xf32, #tpu.memory_space<vmem>>, vector<8x32xf32>
    %c0_1 = arith.constant 0 : index
    %c0_2 = arith.constant 0 : index
    %1 = vector.load %arg2[%c0_1, %c0_2] : memref<32x128xf32, #tpu.memory_space<vmem>>, vector<32x128xf32>
    %c0_3 = arith.constant 0 : index
    %c0_4 = arith.constant 0 : index
    %2 = vector.load %arg3[%c0_3, %c0_4] : memref<1x128xf32, #tpu.memory_space<vmem>>, vector<1x128xf32>
    %cst = arith.constant dense<0.000000e+00> : vector<8x128xf32>
    %3 = tpu.matmul %0, %1, %cst {dimension_numbers = #tpu.dot_dimension_numbers<[1], [0], [0], [1], [0, 0, 1, 1], [], []>} : vector<8x32xf32>, vector<32x128xf32>, vector<8x128xf32> -> vector<8x128xf32>
    %4 = vector.broadcast %2 : vector<1x128xf32> to vector<8x128xf32>
    %5 = arith.addf %3, %4 : vector<8x128xf32>
    %cst_5 = arith.constant 0.000000e+00 : f32
    %6 = vector.broadcast %cst_5 : f32 to vector<8x128xf32>
    %7 = arith.maximumf %5, %6 : vector<8x128xf32>
    %c0_6 = arith.constant 0 : index
    %c0_7 = arith.constant 0 : index
    %8 = vector.load %arg4[%c0_6, %c0_7] : memref<128x128xf32, #tpu.memory_space<vmem>>, vector<128x128xf32>
    %c0_8 = arith.constant 0 : index
    %c0_9 = arith.constant 0 : index
    %9 = vector.load %arg5[%c0_8, %c0_9] : memref<1x128xf32, #tpu.memory_space<vmem>>, vector<1x128xf32>
    %cst_10 = arith.constant dense<0.000000e+00> : vector<8x128xf32>
    %10 = tpu.matmul %7, %8, %cst_10 {dimension_numbers = #tpu.dot_dimension_numbers<[1], [0], [0], [1], [0, 0, 1, 1], [], []>} : vector<8x128xf32>, vector<128x128xf32>, vector<8x128xf32> -> vector<8x128xf32>
    %11 = vector.broadcast %9 : vector<1x128xf32> to vector<8x128xf32>
    %12 = arith.addf %10, %11 : vector<8x128xf32>
    %cst_11 = arith.constant 0.000000e+00 : f32
    %13 = vector.broadcast %cst_11 : f32 to vector<8x128xf32>
    %14 = arith.maximumf %12, %13 : vector<8x128xf32>
    %c0_12 = arith.constant 0 : index
    %c0_13 = arith.constant 0 : index
    %15 = vector.load %arg6[%c0_12, %c0_13] : memref<128x128xf32, #tpu.memory_space<vmem>>, vector<128x128xf32>
    %c0_14 = arith.constant 0 : index
    %c0_15 = arith.constant 0 : index
    %16 = vector.load %arg7[%c0_14, %c0_15] : memref<1x128xf32, #tpu.memory_space<vmem>>, vector<1x128xf32>
    %cst_16 = arith.constant dense<0.000000e+00> : vector<8x128xf32>
    %17 = tpu.matmul %14, %15, %cst_16 {dimension_numbers = #tpu.dot_dimension_numbers<[1], [0], [0], [1], [0, 0, 1, 1], [], []>} : vector<8x128xf32>, vector<128x128xf32>, vector<8x128xf32> -> vector<8x128xf32>
    %18 = vector.broadcast %16 : vector<1x128xf32> to vector<8x128xf32>
    %19 = arith.addf %17, %18 : vector<8x128xf32>
    %20 = math.absf %19 : vector<8x128xf32>
    %cst_17 = arith.constant 0.000000e+00 : f32
    %21 = vector.broadcast %cst_17 : f32 to vector<8x128xf32>
    %22 = arith.subf %21, %20 : vector<8x128xf32>
    %23 = math.exp %22 : vector<8x128xf32>
    %cst_18 = arith.constant 1.000000e+00 : f32
    %24 = vector.broadcast %cst_18 : f32 to vector<8x128xf32>
    %25 = arith.addf %24, %23 : vector<8x128xf32>
    %26 = tpu.reciprocal %25 : vector<8x128xf32> -> vector<8x128xf32>
    %cst_19 = arith.constant 0.000000e+00 : f32
    %27 = vector.broadcast %cst_19 : f32 to vector<8x128xf32>
    %28 = arith.cmpf oge, %19, %27 : vector<8x128xf32>
    %cst_20 = arith.constant 1.000000e+00 : f32
    %29 = vector.broadcast %cst_20 : f32 to vector<8x128xf32>
    %30 = arith.subf %29, %26 : vector<8x128xf32>
    %31 = arith.select %28, %26, %30 : vector<8x128xi1>, vector<8x128xf32>
    %c0_21 = arith.constant 0 : index
    %c0_22 = arith.constant 0 : index
    %32 = vector.load %arg8[%c0_21, %c0_22] : memref<8x128xf32, #tpu.memory_space<vmem>>, vector<8x128xf32>
    tpu.vector_store %arg8[%c0_21, %c0_22], %31 {strides = array<i32>} : memref<8x128xf32, #tpu.memory_space<vmem>>, vector<8x128xf32>,
    return
  }
  func.func @transform_0(%arg0: i32) -> (i32, i32) {
    %c0_i32 = arith.constant 0 : i32
    %c0_i32_0 = arith.constant 0 : i32
    return %arg0, %c0_i32 : i32, i32
  }
  func.func @transform_1(%arg0: i32) -> (i32, i32) {
    %c0_i32 = arith.constant 0 : i32
    %c0_i32_0 = arith.constant 0 : i32
    %c0_i32_1 = arith.constant 0 : i32
    return %c0_i32, %c0_i32_0 : i32, i32
  }
  func.func @transform_2(%arg0: i32) -> (i32, i32) {
    %c0_i32 = arith.constant 0 : i32
    %c0_i32_0 = arith.constant 0 : i32
    %c0_i32_1 = arith.constant 0 : i32
    return %c0_i32, %c0_i32_0 : i32, i32
  }
  func.func @transform_3(%arg0: i32) -> (i32, i32) {
    %c0_i32 = arith.constant 0 : i32
    %c0_i32_0 = arith.constant 0 : i32
    %c0_i32_1 = arith.constant 0 : i32
    return %c0_i32, %c0_i32_0 : i32, i32
  }
  func.func @transform_4(%arg0: i32) -> (i32, i32) {
    %c0_i32 = arith.constant 0 : i32
    %c0_i32_0 = arith.constant 0 : i32
    %c0_i32_1 = arith.constant 0 : i32
    return %c0_i32, %c0_i32_0 : i32, i32
  }
  func.func @transform_5(%arg0: i32) -> (i32, i32) {
    %c0_i32 = arith.constant 0 : i32
    %c0_i32_0 = arith.constant 0 : i32
    %c0_i32_1 = arith.constant 0 : i32
    return %c0_i32, %c0_i32_0 : i32, i32
  }
  func.func @transform_6(%arg0: i32) -> (i32, i32) {
    %c0_i32 = arith.constant 0 : i32
    %c0_i32_0 = arith.constant 0 : i32
    %c0_i32_1 = arith.constant 0 : i32
    return %c0_i32, %c0_i32_0 : i32, i32
  }
  func.func @transform_7(%arg0: i32) -> (i32, i32) {
    %c0_i32 = arith.constant 0 : i32
    %c0_i32_0 = arith.constant 0 : i32
    return %arg0, %c0_i32 : i32, i32
  }
}

</mosaic_0001>

<bundles_post_ra>
// kernel: tpu_custom_call.1
= control target key start
LH: loop header
LB: loop body
LE: loop exit
PB: predicated region body
PF: predicated region fallthrough
CT: control target
= control target key end

     0   :  { %12 = vsyncpa [#allocation3], 0  ;;  %s750_s0 = inlined_call_operand.hbm [shape: f32[8,32], index: 0, kind: input, shape index: {}]   ;;  %s751_s1 = inlined_call_operand.hbm [shape: f32[32,128], index: 1, kind: input, shape index: {}]   ;;  %s752_s2 = inlined_call_operand.vmem [shape: f32[1,128], index: 2, kind: input, shape index: {}]   ;;  %s753_s3 = inlined_call_operand.hbm [shape: f32[128,128], index: 3, kind: input, shape index: {}]   ;;  %s754_s4 = inlined_call_operand.vmem [shape: f32[1,128], index: 4, kind: input, shape index: {}]   ;;  %s755_s5 = inlined_call_operand.hbm [shape: f32[128,128], index: 5, kind: input, shape index: {}]   ;;  %s756_s6 = inlined_call_operand.vmem [shape: f32[1,128], index: 6, kind: input, shape index: {}]   ;;  %s757_s7 = inlined_call_operand.hbm [shape: f32[8,128], index: 7, kind: output, shape index: {}]  }
   0x1   :  { %13 = vsyncpa [#allocation6], 0 }
   0x2   :  { %14 = vsyncpa [#allocation9], 0 }
   0x3   :  { %15 = vsyncpa [#allocation4], 0  ;;  %s626_s24 = smov [#allocation5]  }
   0x4   :  { %s31_s25 = sshll.u32 %s626_s24, 4  ;;  %s32_s25 = int_to_ptr.vmem [resolvable:$true] %s31_s25 }
   0x5   :  { %s526_s26 = scalar_lea.vmem %s32_s25, 512  ;;  %p531_p1 = scmp.lt.s32.totalorder %s32_s25, %s32_s25 }
   0x6   :  { %p527_p0 = scmp.ne.s32.totalorder %s32_s25, %s526_s26  ;;  %p532_p2 = scmp.lt.s32.totalorder %s526_s26, %s526_s26 }
   0x8   :  { %p533_p3 = por %p532_p2, %p531_p1 }
   0xa   :  { %p534_p4 = pnand %p533_p3, %p527_p0 }
   0xc   :  { %537 = shalt.err (!%p534_p4)
}
   0xd   :  { %s627_s27 = smov 128   ;;  %s628_s28 = smov 8  }
   0xe   :  { %37 = dma.hbm_to_vmem [thread:$0]  %s751_s1, 512, %s32_s25, [#allocation6], %s627_s27, %s627_s27, %s628_s28  }
   0xf   :  { %s629_s8 = smov [#allocation2]   ;;  %s630_s10 = smov [#allocation7]  }
  0x10   :  { %s22_s9 = sshll.u32 %s629_s8, 4  ;;  %s45_s11 = sshll.u32 %s630_s10, 4  ;;  %s23_s9 = int_to_ptr.vmem [resolvable:$true] %s22_s9  ;;  %s46_s11 = int_to_ptr.vmem [resolvable:$true] %s45_s11 }
  0x11   :  { %s546_s12 = scalar_lea.vmem %s23_s9, 128  ;;  %p551_p6 = scmp.lt.s32.totalorder %s23_s9, %s23_s9 }
  0x12   :  { %p547_p5 = scmp.ne.s32.totalorder %s23_s9, %s546_s12  ;;  %p552_p7 = scmp.lt.s32.totalorder %s546_s12, %s546_s12 }
  0x14   :  { %p553_p8 = por %p552_p7, %p551_p6 }
  0x16   :  { %p554_p9 = pnand %p553_p8, %p547_p5 }
  0x18   :  { %557 = shalt.err (!%p554_p9)
}
  0x19   :  { %25 = dma.hbm_to_vmem [thread:$0]  %s750_s0, 128, %s23_s9, [#allocation3]  }
  0x1a   :  { %s566_s15 = scalar_lea.vmem %s46_s11, 2048  ;;  %p571_p11 = scmp.lt.s32.totalorder %s46_s11, %s46_s11 }
  0x1b   :  { %p567_p10 = scmp.ne.s32.totalorder %s46_s11, %s566_s15  ;;  %p572_p12 = scmp.lt.s32.totalorder %s566_s15, %s566_s15 }
  0x1d   :  { %p573_p13 = por %p572_p12, %p571_p11 }
  0x1f   :  { %p574_p0 = pnand %p573_p13, %p567_p10 }
  0x21   :  { %577 = shalt.err (!%p574_p0)
}
  0x22   :  { %51 = dma.hbm_to_vmem [thread:$0]  %s753_s3, 2048, %s46_s11, [#allocation6], %s627_s27, %s627_s27, %s628_s28  }
  0x23   :  { %s631_s17 = smov [#allocation8]  }
  0x24   :  { %s59_s18 = sshll.u32 %s631_s17, 4  ;;  %s60_s18 = int_to_ptr.vmem [resolvable:$true] %s59_s18 }
  0x25   :  { %s586_s19 = scalar_lea.vmem %s60_s18, 2048  ;;  %p591_p2 = scmp.lt.s32.totalorder %s60_s18, %s60_s18 }
  0x26   :  { %p587_p1 = scmp.ne.s32.totalorder %s60_s18, %s586_s19  ;;  %p592_p3 = scmp.lt.s32.totalorder %s586_s19, %s586_s19 }
  0x28   :  { %p593_p4 = por %p592_p3, %p591_p2 }
  0x2a   :  { %p594_p5 = pnand %p593_p4, %p587_p1 }
  0x2c   :  { %597 = shalt.err (!%p594_p5)
}
  0x2d   :  { %65 = dma.hbm_to_vmem [thread:$0]  %s755_s5, 2048, %s60_s18, [#allocation9], %s627_s27, %s627_s27, %s628_s28  }
  0x2e   :  { %618 = dma.done.wait [#allocation3], 128  }
  0x2f   :  { %619 = vsyncadd [#allocation3], 4294967168 }
  0x30   :  { %620 = dma.done.wait [#allocation6], 2560  }
  0x31   :  { %621 = vsyncadd [#allocation6], 4294964736 }
  0x32   :  { %622 = dma.done.wait [#allocation9], 2048  }
  0x33   :  { %623 = vsyncadd [#allocation9], 4294965248  ;;  %v632_v0 = vmov 0.0   ;;  %vm633_vm0 = vmmov 0   ;;  %v84_v1 = vld [vmem:[#allocation5 + $0x18] sm:$0xff]  ;;  %v83_v2 = vld [vmem:[#allocation5 + $0x10] sm:$0xff] }
  0x34   :  { %424 = vmatprep.subr.mxu0 %v632_v0  ;;  %432 = vmatprep.mubr.msk.f32.mxu0 %vm633_vm0, %v632_v0  ;;  %v182_v3 = vld [vmem:[#allocation7 + $0x78] sm:$0xff]  ;;  %v82_v4 = vld [vmem:[#allocation5 + $0x8] sm:$0xff]  ;;  %v181_v5 = vld [vmem:[#allocation7 + $0x70] sm:$0xff]  ;;  %vm92_vm1 = vcmask 261120  }
  0x35   :  { %435 = vmatprep.subr.mxu1 %v632_v0  ;;  %467 = vmatprep.mubr.msk.f32.mxu1 %vm633_vm0, %v632_v0  ;;  %v180_v6 = vld [vmem:[#allocation7 + $0x68] sm:$0xff]  ;;  %v81_v7 = vld [vmem:[#allocation5] sm:$0xff]  ;;  %v80_v8 = vld [vmem:[#allocation2] sm:$0xff] }
  0x36   :  { %425 = vmatpush3.msra.mxu0 %v84_v1  ;;  %436 = vmatpush3.msra.mxu1 %v182_v3  ;;  %v179_v9 = vld [vmem:[#allocation7 + $0x60] sm:$0xff]  ;;  %v178_v10 = vld [vmem:[#allocation7 + $0x58] sm:$0xff]  ;;  %v177_v11 = vld [vmem:[#allocation7 + $0x50] sm:$0xff] }
  0x37   :  { %426 = vmatprep.subr.mxu0 %v632_v0  ;;  %437 = vmatprep.subr.mxu1 %v632_v0  ;;  %v176_v12 = vld [vmem:[#allocation7 + $0x48] sm:$0xff]  ;;  %v175_v13 = vld [vmem:[#allocation7 + $0x40] sm:$0xff]  ;;  %v174_v14 = vld [vmem:[#allocation7 + $0x38] sm:$0xff] }
  0x38   :  { %427 = vmatpush3.msra.mxu0 %v83_v2  ;;  %438 = vmatpush3.msra.mxu1 %v181_v5  ;;  %v173_v15 = vld [vmem:[#allocation7 + $0x30] sm:$0xff]  ;;  %v172_v16 = vld [vmem:[#allocation7 + $0x28] sm:$0xff]  ;;  %v171_v17 = vld [vmem:[#allocation7 + $0x20] sm:$0xff] }
  0x39   :  { %428 = vmatprep.subr.mxu0 %v632_v0  ;;  %439 = vmatprep.subr.mxu1 %v632_v0  ;;  %v170_v18 = vld [vmem:[#allocation7 + $0x18] sm:$0xff]  ;;  %v169_v19 = vld [vmem:[#allocation7 + $0x10] sm:$0xff]  ;;  %v168_v20 = vld [vmem:[#allocation7 + $0x8] sm:$0xff] }
  0x3a   :  { %429 = vmatpush3.msra.mxu0 %v82_v4  ;;  %440 = vmatpush3.msra.mxu1 %v180_v6  ;;  %v167_v21 = vld [vmem:[#allocation7] sm:$0xff]  ;;  %v276_v22 = vld [vmem:[#allocation8 + $0x78] sm:$0xff]  ;;  %v275_v23 = vld [vmem:[#allocation8 + $0x70] sm:$0xff] }
  0x3b   :  { %430 = vmatprep.subr.mxu0 %v632_v0  ;;  %441 = vmatprep.subr.mxu1 %v632_v0  ;;  %v274_v24 = vld [vmem:[#allocation8 + $0x68] sm:$0xff]  ;;  %v273_v25 = vld [vmem:[#allocation8 + $0x60] sm:$0xff]  ;;  %v272_v26 = vld [vmem:[#allocation8 + $0x58] sm:$0xff] }
  0x3c   :  { %431 = vmatpush3.msra.mxu0 %v81_v7  ;;  %442 = vmatpush3.msra.mxu1 %v179_v9  ;;  %v271_v27 = vld [vmem:[#allocation8 + $0x50] sm:$0xff]  ;;  %v270_v28 = vld [vmem:[#allocation8 + $0x48] sm:$0xff]  ;;  %v269_v29 = vld [vmem:[#allocation8 + $0x40] sm:$0xff] }
  0x3d   :  { %433 = vmatmul.mubr.msk.f32.vlgmr.msra.gmra.mxu0 %vm92_vm1, %v80_v8  ;;  %443 = vmatprep.subr.mxu1 %v632_v0  ;;  %v268_v30 = vld [vmem:[#allocation8 + $0x38] sm:$0xff]  ;;  %v267_v31 = vld [vmem:[#allocation8 + $0x30] sm:$0xff]  ;;  %v266_v32 = vld [vmem:[#allocation8 + $0x28] sm:$0xff] }
  0x3e   :  { %470 = vmatprep.subr.mxu0 %v632_v0  ;;  %444 = vmatpush3.msra.mxu1 %v178_v10  ;;  %v265_v33 = vld [vmem:[#allocation8 + $0x20] sm:$0xff]  ;;  %v264_v34 = vld [vmem:[#allocation8 + $0x18] sm:$0xff]  ;;  %v263_v40 = vld [vmem:[#allocation8 + $0x10] sm:$0xff] }
  0x3f   :  { %502 = vmatprep.mubr.msk.f32.mxu0 %vm633_vm0, %v632_v0  ;;  %445 = vmatprep.subr.mxu1 %v632_v0  ;;  %v381_v35 = vld [vmem:[%s752_s2] ss:$0 sm:$0xff]  ;;  %v262_v41 = vld [vmem:[#allocation8 + $0x8] sm:$0xff]  ;;  %v261_v42 = vld [vmem:[#allocation8] sm:$0xff] }
  0x40   :  { %446 = vmatpush3.msra.mxu1 %v177_v11  ;;  %471 = vmatpush3.msra.mxu0 %v276_v22  ;;  %v383_v43 = vld [vmem:[%s754_s4] ss:$0 sm:$0xff]  ;;  %s634_s4 = smov [#allocation10]  }
  0x41   :  { %447 = vmatprep.subr.mxu1 %v632_v0  ;;  %472 = vmatprep.subr.mxu0 %v632_v0  ;;  %v384_v48 = vld [vmem:[%s756_s6] ss:$0 sm:$0xff]  ;;  %s370_s24 = sshll.u32 %s634_s4, 4  ;;  %s371_s24 = int_to_ptr.vmem [resolvable:$true] %s370_s24 }
  0x42   :  { %448 = vmatpush3.msra.mxu1 %v176_v12  ;;  %473 = vmatpush3.msra.mxu0 %v275_v23  ;;  %s598_s25 = scalar_lea.vmem %s371_s24, 128  ;;  %p603_p7 = scmp.lt.s32.totalorder %s371_s24, %s371_s24 }
  0x43   :  { %449 = vmatprep.subr.mxu1 %v632_v0  ;;  %474 = vmatprep.subr.mxu0 %v632_v0  ;;  %p599_p6 = scmp.ne.s32.totalorder %s371_s24, %s598_s25  ;;  %p604_p8 = scmp.lt.s32.totalorder %s598_s25, %s598_s25 }
  0x44   :  { %450 = vmatpush3.msra.mxu1 %v175_v13  ;;  %475 = vmatpush3.msra.mxu0 %v274_v24 }
  0x45   :  { %451 = vmatprep.subr.mxu1 %v632_v0  ;;  %476 = vmatprep.subr.mxu0 %v632_v0  ;;  %p605_p9 = por %p604_p8, %p603_p7 }
  0x46   :  { %452 = vmatpush3.msra.mxu1 %v174_v14  ;;  %477 = vmatpush3.msra.mxu0 %v273_v25 }
  0x47   :  { %453 = vmatprep.subr.mxu1 %v632_v0  ;;  %478 = vmatprep.subr.mxu0 %v632_v0  ;;  %p606_p10 = pnand %p605_p9, %p599_p6 }
  0x48   :  { %454 = vmatpush3.msra.mxu1 %v173_v15  ;;  %479 = vmatpush3.msra.mxu0 %v272_v26 }
  0x49   :  { %455 = vmatprep.subr.mxu1 %v632_v0  ;;  %480 = vmatprep.subr.mxu0 %v632_v0 }
  0x4a   :  { %456 = vmatpush3.msra.mxu1 %v172_v16  ;;  %481 = vmatpush3.msra.mxu0 %v271_v27 }
  0x4b   :  { %457 = vmatprep.subr.mxu1 %v632_v0  ;;  %482 = vmatprep.subr.mxu0 %v632_v0 }
  0x4c   :  { %458 = vmatpush3.msra.mxu1 %v171_v17  ;;  %483 = vmatpush3.msra.mxu0 %v270_v28 }
  0x4d   :  { %459 = vmatprep.subr.mxu1 %v632_v0  ;;  %484 = vmatprep.subr.mxu0 %v632_v0 }
  0x4e   :  { %460 = vmatpush3.msra.mxu1 %v170_v18  ;;  %485 = vmatpush3.msra.mxu0 %v269_v29 }
  0x4f   :  { %461 = vmatprep.subr.mxu1 %v632_v0  ;;  %486 = vmatprep.subr.mxu0 %v632_v0 }
  0x50   :  { %462 = vmatpush3.msra.mxu1 %v169_v19  ;;  %487 = vmatpush3.msra.mxu0 %v268_v30 }
  0x51   :  { %463 = vmatprep.subr.mxu1 %v632_v0  ;;  %488 = vmatprep.subr.mxu0 %v632_v0 }
  0x52   :  { %464 = vmatpush3.msra.mxu1 %v168_v20  ;;  %489 = vmatpush3.msra.mxu0 %v267_v31 }
  0x53   :  { %465 = vmatprep.subr.mxu1 %v632_v0  ;;  %490 = vmatprep.subr.mxu0 %v632_v0 }
  0x54   :  { %466 = vmatpush3.msra.mxu1 %v167_v21  ;;  %491 = vmatpush3.msra.mxu0 %v266_v32 }
  0x55   :  { %492 = vmatprep.subr.mxu0 %v632_v0 }
  0x56   :  { %493 = vmatpush3.msra.mxu0 %v265_v33 }
  0x57   :  { %494 = vmatprep.subr.mxu0 %v632_v0 }
  0x58   :  { %495 = vmatpush3.msra.mxu0 %v264_v34 }
  0x59   :  { %496 = vmatprep.subr.mxu0 %v632_v0 }
  0x5a   :  { %497 = vmatpush3.msra.mxu0 %v263_v40 }
  0x5b   :  { %498 = vmatprep.subr.mxu0 %v632_v0 }
  0x5c   :  { %499 = vmatpush3.msra.mxu0 %v262_v41 }
  0x5d   :  { %500 = vmatprep.subr.mxu0 %v632_v0 }
  0x5e   :  { %501 = vmatpush3.msra.mxu0 %v261_v42 }
  0xfd   :  { %v162_v36 = vpop.f32.mrf.mxu0 }
  0xfe   :  { %v163_v37 = vadd.f32 %v381_v35, %v162_v36 }
  0xff   :  { %v434_v38 = vpop.f32.mrf.mxu0 }
 0x100   :  { %v166_v39 = vmax.f32 %v163_v37, 0.0 }
 0x102   :  { %468 = vmatmul.mubr.f32.vlgmr.msra.gmra.mxu1 %v166_v39 }
 0x1c2   :  { %v256_v44 = vpop.f32.mrf.mxu1 }
 0x1c3   :  { %v257_v45 = vadd.f32 %v383_v43, %v256_v44 }
 0x1c4   :  { %v469_v46 = vpop.f32.mrf.mxu1 }
 0x1c5   :  { %v260_v47 = vmax.f32 %v257_v45, 0.0 }
 0x1c7   :  { %503 = vmatmul.mubr.f32.vlgmr.msra.gmra.mxu0 %v260_v47 }
 0x287   :  { %v350_v49 = vpop.f32.mrf.mxu0 }
 0x288   :  { %v351_v50 = vadd.f32 %v384_v48, %v350_v49 }
 0x289   :  { %v504_v51 = vpop.f32.mrf.mxu0 }
 0x28a   :  { %v354_v52 = vand.u32 2147483647, %v351_v50  ;;  %vm360_vm2 = vcmp.ge.f32.partialorder %v351_v50, 0.0 }
 0x28c   :  { %v355_v53 = vsub.f32 0.0, %v354_v52 }
 0x28e   :  { %v356_v54 = vmul.f32 1.442695, %v355_v53 }
 0x290   :  { %514 = vpow2.f32 %v356_v54 }
 0x29d   :  { %v515_v55 = vpop.eup %514 }
 0x29e   :  { %v358_v56 = vadd.f32 1.0, %v515_v55 }
 0x2a0   :  { %516 = vrcp.f32 %v358_v56 }
 0x2ad   :  { %v517_v57 = vpop.eup %516 }
 0x2ae   :  { %v361_v58 = vsub.f32 1.0, %v517_v57 }
 0x2b0   :  { %v362_v59 = vsel %vm360_vm2, %v517_v57, %v361_v58 }
 0x2b1   :  { %363 = vst [vmem:[#allocation10] sm:$0xff] %v362_v59 }
 0x2b2   :  { %609 = shalt.err (!%p606_p10)
}
 0x2b3   :  { %373 = dma.vmem_to_hbm [thread:$0]  %s371_s24, 128, %s757_s7, [#allocation4]  }
 0x2b4   :  { %624 = dma.done.wait [#allocation4], 128  }
 0x2b5   :  { %625 = vsyncadd [#allocation4], 4294967168 }
 0x2b6   :  { %377 = vsyncpa [#allocation3], 1 }
 0x2b7   :  { %378 = vsyncpa [#allocation6], 1 }
 0x2b8   :  { %379 = vsyncpa [#allocation9], 1 }
 0x2b9   :  { %380 = vsyncpa [#allocation4], 1 }

</bundles_post_ra>
